<compile_context>
chip_gen: v7x
topology: tpu7x:2x2x1
jax: 0.10.0
libtpu: 0.0.40
codegen_flags: <defaults>
</compile_context>

<pallas_src>
import functools

import jax
import jax.numpy as jnp
from jax.experimental import pallas as pl
from jax.experimental.pallas import tpu as pltpu


# ---------------------------------------------------------------- kernel A ---
def conv_stats_kernel(xm_ref, xh_ref, wm_ref, wh_ref, sum_ref, m2_ref,
                      s_acc, m2_acc, *, nb, tm, hw, t_inner_n, padded):
    """1x1 conv on an (nb, Cin, tm) pixel block + chunked BN statistics.

    Per (batch-block, outer-chunk) the per-tile (sum, centered-M2) are merged
    into VMEM scratch with Chan's parallel-variance identity; only one tiny
    (Cout, 1) pair is written back per chunk (not per tile).
    """
    to = pl.program_id(1)
    ti = pl.program_id(2)
    wm = wm_ref[...]
    wh = wh_ref[...]
    c_out = wm.shape[0]

    pix0 = (to * t_inner_n + ti) * tm                       # first pixel of this tile
    cnt_b = (nb * jnp.clip(hw - pix0, 0, tm)).astype(jnp.float32)
    if padded:
        lane = jax.lax.broadcasted_iota(jnp.int32, (1, tm), 1)
        valid = (pix0 + lane) < hw                          # (1, tm) lane mask

    # Transposed-layout conv: y_i = W (Cout,Cin) @ x_i (Cin,tm); lanes = pixels.
    ys = []
    s_b = jnp.zeros((c_out, 1), jnp.float32)
    for i in range(nb):
        yi = jnp.dot(wm, xm_ref[i], preferred_element_type=jnp.float32)
        yi = yi + jnp.dot(wh, xh_ref[i], preferred_element_type=jnp.float32)
        if padded:
            yi = jnp.where(valid, yi, 0.0)
        ys.append(yi)
        s_b = s_b + jnp.sum(yi, axis=1, keepdims=True)

    mu_b = s_b / jnp.maximum(cnt_b, 1.0)                    # tile mean (stable centering)
    m2_b = jnp.zeros((c_out, 1), jnp.float32)
    for yi in ys:
        d = yi - mu_b
        if padded:
            d = jnp.where(valid, d, 0.0)
        m2_b = m2_b + jnp.sum(d * d, axis=1, keepdims=True)

    @pl.when(ti == 0)
    def _():
        s_acc[...] = s_b
        m2_acc[...] = m2_b

    @pl.when(ti > 0)
    def _():
        # Chan parallel-variance merge of (s_b, m2_b, cnt_b) into the running
        # chunk accumulator; fully-padded tiles contribute exactly zero.
        n_a = (nb * jnp.clip(hw - to * (t_inner_n * tm), 0, ti * tm)).astype(jnp.float32)
        s_a = s_acc[...]
        m2_a = m2_acc[...]
        delta = s_b / jnp.maximum(cnt_b, 1.0) - s_a / jnp.maximum(n_a, 1.0)
        s_acc[...] = s_a + s_b
        m2_acc[...] = (m2_a + m2_b
                       + delta * delta * (n_a * cnt_b) / jnp.maximum(n_a + cnt_b, 1.0))

    @pl.when(ti == pl.num_programs(2) - 1)
    def _():
        sum_ref[0, 0] = s_acc[...]
        m2_ref[0, 0] = m2_acc[...]


# ---------------------------------------------------------------- kernel B ---
def norm_silu_kernel(xm_ref, xh_ref, wm_ref, wh_ref, scale_ref, shift_ref, o_ref,
                     *, nb):
    """Recompute the (cheap) 1x1 conv, apply folded BN affine, then SiLU."""
    wm = wm_ref[...]
    wh = wh_ref[...]
    scale = scale_ref[...]                                  # (Cout, 1) lane-broadcast
    shift = shift_ref[...]
    for i in range(nb):
        y = jnp.dot(wm, xm_ref[i], preferred_element_type=jnp.float32)
        y = y + jnp.dot(wh, xh_ref[i], preferred_element_type=jnp.float32)
        xn = y * scale + shift
        o_ref[i] = (xn * jax.nn.sigmoid(xn)).astype(o_ref.dtype)


# ----------------------------------------------------------------- helpers ---
def _vmem_budget():
    """(vmem_limit_bytes, per-step working-set budget) derived from the chip."""
    cap = None
    try:
        cap = int(getattr(pltpu.get_tpu_info(), "vmem_capacity_bytes", 0)) or None
    except Exception:
        cap = None
    if cap is None:
        cap = 64 * 1024 * 1024                      # conservative: v7x per-TC VMEM
    limit = min(96 * 1024 * 1024, (3 * cap) // 4)   # 96 MiB on v5e/v6e, 48 MiB on v7x
    return limit, limit // 4


def _pick_tile(hw, per_pix_bytes, budget):
    """Pixel tile: full H*W when it fits, else the multiple of 128 (<= cap)
    that minimizes padding (ties -> larger tile).  Returns (tm, n_tiles)."""
    cap = (budget // max(per_pix_bytes, 1)) // 128 * 128
    cap = max(128, min(2048, cap))
    if hw <= cap:
        return hw, 1
    best_t, best_pad = 128, pl.cdiv(hw, 128) * 128
    for t in range(256, cap + 1, 128):
        padded = pl.cdiv(hw, t) * t
        if padded <= best_pad:
            best_t, best_pad = t, padded
    return best_t, best_pad // best_t


# ----------------------------------------------------------------- wrapper ---
def hf_injector(f_main, f_hf, w, gamma, beta, *, eps=1e-5, tm=None):
    """
    f_main: (N, c_main, H, W)    f_hf: (N, c_hf, H, W)   (f32 or bf16)
    w:      (c_main, c_main + c_hf)   # Conv2d(c_main+c_hf, c_main, 1, bias=False) weight
    gamma, beta: (c_main,)            # BatchNorm2d affine parameters

    SiLU(BatchNorm(Conv1x1(concat([f_main, f_hf], 1)))) with batch statistics.
    """
    n, c_main, h, wd = f_main.shape
    c_hf = f_hf.shape[1]
    c_out = c_main
    hw = h * wd
    dtype = f_main.dtype
    if w.ndim == 4:
        w = w.reshape(w.shape[0], -1)

    bpe = jnp.dtype(dtype).itemsize
    # per-pixel VMEM bytes per grid step: x tiles + output tile + f32 y intermediate
    per_pix = (c_main + c_hf) * bpe + c_out * bpe + c_out * 4
    vmem_limit, budget = _vmem_budget()

    if tm is None:
        tm, t_tiles = _pick_tile(hw, per_pix, budget)
    else:
        tm = min(tm, hw)
        assert tm == hw or tm % 128 == 0, "tm must be a multiple of 128 or the full H*W"
        t_tiles = pl.cdiv(hw, tm)

    # Fold nb batch images into each grid step (small images / tiny channels);
    # nb must divide N.
    nb = 1
    nb_cap = max(1, budget // max(tm * per_pix, 1))
    for d in range(min(n, nb_cap, 8), 0, -1):
        if n % d == 0:
            nb = d
            break
    n_blocks = n // nb

    # v7x megacore: keep >= 2 parallel chunks when the batch axis collapses.
    t_outer_n = 2 if (n_blocks == 1 and t_tiles >= 2) else 1
    t_tiles = pl.cdiv(t_tiles, t_outer_n) * t_outer_n
    t_inner_n = t_tiles // t_outer_n
    hw_pad = t_tiles * tm
    padded = hw_pad != hw

    # NCHW is already (channels x pixels) per image: reshape only, no transpose.
    xm = f_main.reshape(n, c_main, hw)
    xh = f_hf.reshape(n, c_hf, hw)
    if padded:
        # Only misaligned H*W pays this copy; padded pixels are masked out of
        # the statistics in pass 1 and sliced away after pass 2.
        xm = jnp.pad(xm, ((0, 0), (0, 0), (0, hw_pad - hw)))
        xh = jnp.pad(xh, ((0, 0), (0, 0), (0, hw_pad - hw)))
    wm = w[:, :c_main].astype(dtype)     # (Cout, c_main): the channel concat is
    wh = w[:, c_main:].astype(dtype)     # (Cout, c_hf)    folded into a weight split

    cparams3 = pltpu.CompilerParams(
        dimension_semantics=("parallel", "parallel", "arbitrary"),
        vmem_limit_bytes=vmem_limit)
    cparams2 = pltpu.CompilerParams(
        dimension_semantics=("parallel", "parallel"),
        vmem_limit_bytes=vmem_limit)

    # ---- pass 1: conv + chunked batch statistics (tiny per-chunk writebacks) --
    stat_spec = pl.BlockSpec((1, 1, c_out, 1), lambda b, to, ti: (b, to, 0, 0))
    sums, m2s = pl.pallas_call(
        functools.partial(conv_stats_kernel, nb=nb, tm=tm, hw=hw,
                          t_inner_n=t_inner_n, padded=padded),
        out_shape=(jax.ShapeDtypeStruct((n_blocks, t_outer_n, c_out, 1), jnp.float32),
                   jax.ShapeDtypeStruct((n_blocks, t_outer_n, c_out, 1), jnp.float32)),
        grid_spec=pltpu.PrefetchScalarGridSpec(
            num_scalar_prefetch=0,
            grid=(n_blocks, t_outer_n, t_inner_n),
            in_specs=[
                pl.BlockSpec((nb, c_main, tm),
                             lambda b, to, ti: (b, 0, to * t_inner_n + ti)),
                pl.BlockSpec((nb, c_hf, tm),
                             lambda b, to, ti: (b, 0, to * t_inner_n + ti)),
                pl.BlockSpec((c_out, c_main), lambda b, to, ti: (0, 0)),
                pl.BlockSpec((c_out, c_hf), lambda b, to, ti: (0, 0)),
            ],
            out_specs=[stat_spec, stat_spec],
            scratch_shapes=[pltpu.VMEM((c_out, 1), jnp.float32),
                            pltpu.VMEM((c_out, 1), jnp.float32)]),
        compiler_params=cparams3,
    )(xm, xh, wm, wh)

    # ---- tiny XLA combine: within+between chunk variance, fold BN affine ------
    m_total = jnp.float32(n * hw)
    chunk_pix = t_inner_n * tm
    cnt = (nb * jnp.clip(hw - jnp.arange(t_outer_n) * chunk_pix, 0, chunk_pix)
           ).astype(jnp.float32)                                    # (t_outer_n,)
    s_c = sums[..., 0]                                              # (n_blocks, t_outer_n, Cout)
    m2_c = m2s[..., 0]
    mean = jnp.sum(s_c, axis=(0, 1)) / m_total                      # (Cout,)
    cmean = s_c / jnp.maximum(cnt, 1.0)[None, :, None]
    between = jnp.sum(cnt[None, :, None] * (cmean - mean) ** 2, axis=(0, 1))
    var = (jnp.sum(m2_c, axis=(0, 1)) + between) / m_total          # biased (BN training)
    scale = gamma.astype(jnp.float32) * jax.lax.rsqrt(var + eps)
    shift = beta.astype(jnp.float32) - mean * scale
    scale2 = scale.reshape(c_out, 1)
    shift2 = shift.reshape(c_out, 1)

    # ---- pass 2: recompute cheap conv, folded BN + SiLU, lane-dense output ----
    out = pl.pallas_call(
        functools.partial(norm_silu_kernel, nb=nb),
        out_shape=jax.ShapeDtypeStruct((n, c_out, hw_pad), dtype),
        grid_spec=pltpu.PrefetchScalarGridSpec(
            num_scalar_prefetch=0,
            grid=(n_blocks, t_tiles),
            in_specs=[
                pl.BlockSpec((nb, c_main, tm), lambda b, t: (b, 0, t)),
                pl.BlockSpec((nb, c_hf, tm), lambda b, t: (b, 0, t)),
                pl.BlockSpec((c_out, c_main), lambda b, t: (0, 0)),
                pl.BlockSpec((c_out, c_hf), lambda b, t: (0, 0)),
                pl.BlockSpec((c_out, 1), lambda b, t: (0, 0)),
                pl.BlockSpec((c_out, 1), lambda b, t: (0, 0)),
            ],
            out_specs=pl.BlockSpec((nb, c_out, tm), lambda b, t: (b, 0, t))),
        compiler_params=cparams2,
    )(xm, xh, wm, wh, scale2, shift2)

    if padded:
        out = out[:, :, :hw]
    return out.reshape(n, c_out, h, wd)                             # free reshape, NCHW


# --------------------------------------------------------------- reference ---
def hf_injector_ref(f_main, f_hf, w, gamma, beta, *, eps=1e-5):
    x = jnp.concatenate([f_main, f_hf], axis=1)                     # (N, Cin, H, W)
    y = jnp.einsum("oc,nchw->nohw", w, x)                           # 1x1 conv, no bias
    mean = y.mean(axis=(0, 2, 3), keepdims=True)
    var = ((y - mean) ** 2).mean(axis=(0, 2, 3), keepdims=True)     # biased (BN train)
    xn = (y - mean) * jax.lax.rsqrt(var + eps)
    xn = xn * gamma.reshape(1, -1, 1, 1) + beta.reshape(1, -1, 1, 1)
    return xn * jax.nn.sigmoid(xn)


if __name__ == "__main__":
    key = jax.random.PRNGKey(0)
    k1, k2, k3, k4, k5 = jax.random.split(key, 5)

    # ---- case 1: the module's nominal small shape (f32, tile-aligned) --------
    N, C_MAIN, C_HF, H, W = 2, 4, 4, 16, 16
    f_main = jax.random.normal(k1, (N, C_MAIN, H, W), dtype=jnp.float32)
    f_hf = jax.random.normal(k2, (N, C_HF, H, W), dtype=jnp.float32)
    w = jax.random.normal(k3, (C_MAIN, C_MAIN + C_HF), dtype=jnp.float32) * 0.1
    gamma = 1.0 + 0.1 * jax.random.normal(k4, (C_MAIN,), dtype=jnp.float32)
    beta = 0.1 * jax.random.normal(k5, (C_MAIN,), dtype=jnp.float32)

    out = jax.block_until_ready(hf_injector(f_main, f_hf, w, gamma, beta))
    ref = hf_injector_ref(f_main, f_hf, w, gamma, beta)
    assert out.shape == (N, C_MAIN, H, W)
    assert jnp.allclose(out, ref, atol=1e-4, rtol=1e-4), "mismatch vs reference"

    # ---- case 2: bf16 I/O path (HBM-bound op -> ~2x fewer bytes/pixel) -------
    out_bf16 = jax.block_until_ready(
        hf_injector(f_main.astype(jnp.bfloat16), f_hf.astype(jnp.bfloat16),
                    w, gamma, beta))
    assert out_bf16.dtype == jnp.bfloat16 and out_bf16.shape == (N, C_MAIN, H, W)
    assert bool(jnp.all(jnp.isfinite(out_bf16.astype(jnp.float32))))

    # ---- case 3: misaligned H*W -> pad + mask + chunked Chan-merge path ------
    N2, CM2, CH2, H2, W2 = 1, 6, 2, 23, 23          # hw=529, forced tm=128
    fm2 = jax.random.normal(k1, (N2, CM2, H2, W2), dtype=jnp.float32)
    fh2 = jax.random.normal(k2, (N2, CH2, H2, W2), dtype=jnp.float32)
    w2 = jax.random.normal(k3, (CM2, CM2 + CH2), dtype=jnp.float32) * 0.1
    g2 = 1.0 + 0.1 * jax.random.normal(k4, (CM2,), dtype=jnp.float32)
    b2 = 0.1 * jax.random.normal(k5, (CM2,), dtype=jnp.float32)
    out2 = jax.block_until_ready(hf_injector(fm2, fh2, w2, g2, b2, tm=128))
    ref2 = hf_injector_ref(fm2, fh2, w2, g2, b2)
    assert out2.shape == (N2, CM2, H2, W2)
    assert jnp.allclose(out2, ref2, atol=1e-4, rtol=1e-4), "mismatch (padded path)"

    print("KERNEL_OK")
</pallas_src>

<mosaic_0001>
module attributes {stable_mosaic.version = 11 : i64} {
  func.func @conv_stats_kernel(%arg0: i32, %arg1: i32, %arg2: i32, %arg3: memref<2x4x256xf32, #tpu.memory_space<vmem>>, %arg4: memref<2x4x256xf32, #tpu.memory_space<vmem>>, %arg5: memref<4x4xf32, #tpu.memory_space<vmem>>, %arg6: memref<4x4xf32, #tpu.memory_space<vmem>>, %arg7: memref<1x1x4x1xf32, #tpu.memory_space<vmem>>, %arg8: memref<1x1x4x1xf32, #tpu.memory_space<vmem>>, %arg9: memref<4x1xf32, #tpu.memory_space<vmem>>, %arg10: memref<4x1xf32, #tpu.memory_space<vmem>>) attributes {dimension_semantics = [#tpu.dimension_semantics<parallel>, #tpu.dimension_semantics<parallel>, #tpu.dimension_semantics<arbitrary>], iteration_bounds = array<i64: 1, 1, 1>, scalar_prefetch = 0 : i64, scratch_operands = 2 : i64, tpu.core_type = #tpu.core_type<tc>, window_params = [{transform_indices = @transform_0, window_bounds = array<i64: 2, 4, 256>}, {transform_indices = @transform_1, window_bounds = array<i64: 2, 4, 256>}, {pipeline_mode = #tpu.pipeline_mode<synchronous>, transform_indices = @transform_2, window_bounds = array<i64: 4, 4>}, {pipeline_mode = #tpu.pipeline_mode<synchronous>, transform_indices = @transform_3, window_bounds = array<i64: 4, 4>}, {transform_indices = @transform_4, window_bounds = array<i64: 1, 1, 4, 1>}, {transform_indices = @transform_5, window_bounds = array<i64: 1, 1, 4, 1>}]} {
    %c0 = arith.constant 0 : index
    %c0_0 = arith.constant 0 : index
    %0 = vector.load %arg5[%c0, %c0_0] : memref<4x4xf32, #tpu.memory_space<vmem>>, vector<4x4xf32>
    %c0_1 = arith.constant 0 : index
    %c0_2 = arith.constant 0 : index
    %1 = vector.load %arg6[%c0_1, %c0_2] : memref<4x4xf32, #tpu.memory_space<vmem>>, vector<4x4xf32>
    %c1_i32 = arith.constant 1 : i32
    %2 = arith.muli %arg1, %c1_i32 : i32
    %3 = arith.addi %2, %arg2 : i32
    %c256_i32 = arith.constant 256 : i32
    %4 = arith.muli %3, %c256_i32 : i32
    %c256_i32_3 = arith.constant 256 : i32
    %5 = arith.subi %c256_i32_3, %4 : i32
    %c0_i32 = arith.constant 0 : i32
    %c256_i32_4 = arith.constant 256 : i32
    %6 = arith.maxsi %c0_i32, %5 : i32
    %7 = arith.minsi %c256_i32_4, %6 : i32
    %c2_i32 = arith.constant 2 : i32
    %8 = arith.muli %c2_i32, %7 : i32
    %9 = arith.sitofp %8 : i32 to f32
    %cst = arith.constant 0.000000e+00 : f32
    %10 = vector.broadcast %cst : f32 to vector<4x1xf32>
    %c0_5 = arith.constant 0 : index
    %c0_6 = arith.constant 0 : index
    %c0_7 = arith.constant 0 : index
    %11 = vector.load %arg3[%c0_5, %c0_6, %c0_7] : memref<2x4x256xf32, #tpu.memory_space<vmem>>, vector<1x4x256xf32>
    %12 = vector.shape_cast %11 : vector<1x4x256xf32> to vector<4x256xf32>
    %cst_8 = arith.constant dense<0.000000e+00> : vector<4x256xf32>
    %13 = tpu.matmul %0, %12, %cst_8 {dimension_numbers = #tpu.dot_dimension_numbers<[1], [0], [0], [1], [0, 0, 1, 1], [], []>} : vector<4x4xf32>, vector<4x256xf32>, vector<4x256xf32> -> vector<4x256xf32>
    %c0_9 = arith.constant 0 : index
    %c0_10 = arith.constant 0 : index
    %c0_11 = arith.constant 0 : index
    %14 = vector.load %arg4[%c0_9, %c0_10, %c0_11] : memref<2x4x256xf32, #tpu.memory_space<vmem>>, vector<1x4x256xf32>
    %15 = vector.shape_cast %14 : vector<1x4x256xf32> to vector<4x256xf32>
    %cst_12 = arith.constant dense<0.000000e+00> : vector<4x256xf32>
    %16 = tpu.matmul %1, %15, %cst_12 {dimension_numbers = #tpu.dot_dimension_numbers<[1], [0], [0], [1], [0, 0, 1, 1], [], []>} : vector<4x4xf32>, vector<4x256xf32>, vector<4x256xf32> -> vector<4x256xf32>
    %17 = arith.addf %13, %16 : vector<4x256xf32>
    %cst_13 = arith.constant dense<0.000000e+00> : vector<4xf32>
    %18 = vector.multi_reduction <add>, %17, %cst_13 [1] : vector<4x256xf32> to vector<4xf32>
    %19 = vector.shape_cast %18 : vector<4xf32> to vector<4x1xf32>
    %20 = arith.addf %10, %19 : vector<4x1xf32>
    %c1 = arith.constant 1 : index
    %c0_14 = arith.constant 0 : index
    %c0_15 = arith.constant 0 : index
    %21 = vector.load %arg3[%c1, %c0_14, %c0_15] : memref<2x4x256xf32, #tpu.memory_space<vmem>>, vector<1x4x256xf32>
    %22 = vector.shape_cast %21 : vector<1x4x256xf32> to vector<4x256xf32>
    %cst_16 = arith.constant dense<0.000000e+00> : vector<4x256xf32>
    %23 = tpu.matmul %0, %22, %cst_16 {dimension_numbers = #tpu.dot_dimension_numbers<[1], [0], [0], [1], [0, 0, 1, 1], [], []>} : vector<4x4xf32>, vector<4x256xf32>, vector<4x256xf32> -> vector<4x256xf32>
    %c1_17 = arith.constant 1 : index
    %c0_18 = arith.constant 0 : index
    %c0_19 = arith.constant 0 : index
    %24 = vector.load %arg4[%c1_17, %c0_18, %c0_19] : memref<2x4x256xf32, #tpu.memory_space<vmem>>, vector<1x4x256xf32>
    %25 = vector.shape_cast %24 : vector<1x4x256xf32> to vector<4x256xf32>
    %cst_20 = arith.constant dense<0.000000e+00> : vector<4x256xf32>
    %26 = tpu.matmul %1, %25, %cst_20 {dimension_numbers = #tpu.dot_dimension_numbers<[1], [0], [0], [1], [0, 0, 1, 1], [], []>} : vector<4x4xf32>, vector<4x256xf32>, vector<4x256xf32> -> vector<4x256xf32>
    %27 = arith.addf %23, %26 : vector<4x256xf32>
    %cst_21 = arith.constant dense<0.000000e+00> : vector<4xf32>
    %28 = vector.multi_reduction <add>, %27, %cst_21 [1] : vector<4x256xf32> to vector<4xf32>
    %29 = vector.shape_cast %28 : vector<4xf32> to vector<4x1xf32>
    %30 = arith.addf %20, %29 : vector<4x1xf32>
    %cst_22 = arith.constant 1.000000e+00 : f32
    %31 = arith.maximumf %9, %cst_22 : f32
    %32 = vector.broadcast %31 : f32 to vector<4x1xf32>
    %33 = arith.divf %30, %32 : vector<4x1xf32>
    %cst_23 = arith.constant 0.000000e+00 : f32
    %34 = vector.broadcast %cst_23 : f32 to vector<4x1xf32>
    %35 = vector.broadcast %33 : vector<4x1xf32> to vector<4x256xf32>
    %36 = arith.subf %17, %35 : vector<4x256xf32>
    %37 = arith.mulf %36, %36 : vector<4x256xf32>
    %cst_24 = arith.constant dense<0.000000e+00> : vector<4xf32>
    %38 = vector.multi_reduction <add>, %37, %cst_24 [1] : vector<4x256xf32> to vector<4xf32>
    %39 = vector.shape_cast %38 : vector<4xf32> to vector<4x1xf32>
    %40 = arith.addf %34, %39 : vector<4x1xf32>
    %41 = vector.broadcast %33 : vector<4x1xf32> to vector<4x256xf32>
    %42 = arith.subf %27, %41 : vector<4x256xf32>
    %43 = arith.mulf %42, %42 : vector<4x256xf32>
    %cst_25 = arith.constant dense<0.000000e+00> : vector<4xf32>
    %44 = vector.multi_reduction <add>, %43, %cst_25 [1] : vector<4x256xf32> to vector<4xf32>
    %45 = vector.shape_cast %44 : vector<4xf32> to vector<4x1xf32>
    %46 = arith.addf %40, %45 : vector<4x1xf32>
    %c0_i32_26 = arith.constant 0 : i32
    %47 = arith.cmpi eq, %arg2, %c0_i32_26 : i32
    %48 = arith.extui %47 : i1 to i32
    %c0_i32_27 = arith.constant 0 : i32
    %49 = arith.cmpi ne, %48, %c0_i32_27 : i32
    scf.if %49 {
      %c0_32 = arith.constant 0 : index
      %c0_33 = arith.constant 0 : index
      %56 = vector.load %arg9[%c0_32, %c0_33] : memref<4x1xf32, #tpu.memory_space<vmem>>, vector<4x1xf32>
      tpu.vector_store %arg9[%c0_32, %c0_33], %30 {strides = array<i32>} : memref<4x1xf32, #tpu.memory_space<vmem>>, vector<4x1xf32>,
      %c0_34 = arith.constant 0 : index
      %c0_35 = arith.constant 0 : index
      %57 = vector.load %arg10[%c0_34, %c0_35] : memref<4x1xf32, #tpu.memory_space<vmem>>, vector<4x1xf32>
      tpu.vector_store %arg10[%c0_34, %c0_35], %46 {strides = array<i32>} : memref<4x1xf32, #tpu.memory_space<vmem>>, vector<4x1xf32>,
    } else {
    }
    %c0_i32_28 = arith.constant 0 : i32
    %50 = arith.cmpi sgt, %arg2, %c0_i32_28 : i32
    %51 = arith.extui %50 : i1 to i32
    %c0_i32_29 = arith.constant 0 : i32
    %52 = arith.cmpi ne, %51, %c0_i32_29 : i32
    scf.if %52 {
      %c256_i32_32 = arith.constant 256 : i32
      %56 = arith.muli %arg1, %c256_i32_32 : i32
      %c256_i32_33 = arith.constant 256 : i32
      %57 = arith.subi %c256_i32_33, %56 : i32
      %c256_i32_34 = arith.constant 256 : i32
      %58 = arith.muli %arg2, %c256_i32_34 : i32
      %c0_i32_35 = arith.constant 0 : i32
      %59 = arith.maxsi %c0_i32_35, %57 : i32
      %60 = arith.minsi %58, %59 : i32
      %c2_i32_36 = arith.constant 2 : i32
      %61 = arith.muli %c2_i32_36, %60 : i32
      %62 = arith.sitofp %61 : i32 to f32
      %c0_37 = arith.constant 0 : index
      %c0_38 = arith.constant 0 : index
      %63 = vector.load %arg9[%c0_37, %c0_38] : memref<4x1xf32, #tpu.memory_space<vmem>>, vector<4x1xf32>
      %c0_39 = arith.constant 0 : index
      %c0_40 = arith.constant 0 : index
      %64 = vector.load %arg10[%c0_39, %c0_40] : memref<4x1xf32, #tpu.memory_space<vmem>>, vector<4x1xf32>
      %cst_41 = arith.constant 1.000000e+00 : f32
      %65 = arith.maximumf %9, %cst_41 : f32
      %66 = vector.broadcast %65 : f32 to vector<4x1xf32>
      %67 = arith.divf %30, %66 : vector<4x1xf32>
      %cst_42 = arith.constant 1.000000e+00 : f32
      %68 = arith.maximumf %62, %cst_42 : f32
      %69 = vector.broadcast %68 : f32 to vector<4x1xf32>
      %70 = arith.divf %63, %69 : vector<4x1xf32>
      %71 = arith.subf %67, %70 : vector<4x1xf32>
      %72 = arith.addf %63, %30 : vector<4x1xf32>
      %c0_43 = arith.constant 0 : index
      %c0_44 = arith.constant 0 : index
      %73 = vector.load %arg9[%c0_43, %c0_44] : memref<4x1xf32, #tpu.memory_space<vmem>>, vector<4x1xf32>
      tpu.vector_store %arg9[%c0_43, %c0_44], %72 {strides = array<i32>} : memref<4x1xf32, #tpu.memory_space<vmem>>, vector<4x1xf32>,
      %74 = arith.addf %64, %46 : vector<4x1xf32>
      %75 = arith.mulf %71, %71 : vector<4x1xf32>
      %76 = arith.mulf %62, %9 : f32
      %77 = vector.broadcast %76 : f32 to vector<4x1xf32>
      %78 = arith.mulf %75, %77 : vector<4x1xf32>
      %79 = arith.addf %62, %9 : f32
      %cst_45 = arith.constant 1.000000e+00 : f32
      %80 = arith.maximumf %79, %cst_45 : f32
      %81 = vector.broadcast %80 : f32 to vector<4x1xf32>
      %82 = arith.divf %78, %81 : vector<4x1xf32>
      %83 = arith.addf %74, %82 : vector<4x1xf32>
      %c0_46 = arith.constant 0 : index
      %c0_47 = arith.constant 0 : index
      %84 = vector.load %arg10[%c0_46, %c0_47] : memref<4x1xf32, #tpu.memory_space<vmem>>, vector<4x1xf32>
      tpu.vector_store %arg10[%c0_46, %c0_47], %83 {strides = array<i32>} : memref<4x1xf32, #tpu.memory_space<vmem>>, vector<4x1xf32>,
    } else {
    }
    %c0_i32_30 = arith.constant 0 : i32
    %53 = arith.cmpi eq, %arg2, %c0_i32_30 : i32
    %54 = arith.extui %53 : i1 to i32
    %c0_i32_31 = arith.constant 0 : i32
    %55 = arith.cmpi ne, %54, %c0_i32_31 : i32
    scf.if %55 {
      %c0_32 = arith.constant 0 : index
      %c0_33 = arith.constant 0 : index
      %56 = vector.load %arg9[%c0_32, %c0_33] : memref<4x1xf32, #tpu.memory_space<vmem>>, vector<4x1xf32>
      %c0_34 = arith.constant 0 : index
      %c0_35 = arith.constant 0 : index
      %c0_36 = arith.constant 0 : index
      %c0_37 = arith.constant 0 : index
      %57 = vector.load %arg7[%c0_34, %c0_35, %c0_36, %c0_37] : memref<1x1x4x1xf32, #tpu.memory_space<vmem>>, vector<1x1x4x1xf32>
      %58 = vector.shape_cast %57 : vector<1x1x4x1xf32> to vector<4x1xf32>
      %59 = vector.shape_cast %56 : vector<4x1xf32> to vector<1x1x4x1xf32>
      tpu.vector_store %arg7[%c0_34, %c0_35, %c0_36, %c0_37], %59 {strides = array<i32>} : memref<1x1x4x1xf32, #tpu.memory_space<vmem>>, vector<1x1x4x1xf32>,
      %c0_38 = arith.constant 0 : index
      %c0_39 = arith.constant 0 : index
      %60 = vector.load %arg10[%c0_38, %c0_39] : memref<4x1xf32, #tpu.memory_space<vmem>>, vector<4x1xf32>
      %c0_40 = arith.constant 0 : index
      %c0_41 = arith.constant 0 : index
      %c0_42 = arith.constant 0 : index
      %c0_43 = arith.constant 0 : index
      %61 = vector.load %arg8[%c0_40, %c0_41, %c0_42, %c0_43] : memref<1x1x4x1xf32, #tpu.memory_space<vmem>>, vector<1x1x4x1xf32>
      %62 = vector.shape_cast %61 : vector<1x1x4x1xf32> to vector<4x1xf32>
      %63 = vector.shape_cast %60 : vector<4x1xf32> to vector<1x1x4x1xf32>
      tpu.vector_store %arg8[%c0_40, %c0_41, %c0_42, %c0_43], %63 {strides = array<i32>} : memref<1x1x4x1xf32, #tpu.memory_space<vmem>>, vector<1x1x4x1xf32>,
    } else {
    }
    return
  }
  func.func @transform_0(%arg0: i32, %arg1: i32, %arg2: i32) -> (i32, i32, i32) {
    %c1_i32 = arith.constant 1 : i32
    %0 = arith.muli %arg1, %c1_i32 : i32
    %1 = arith.addi %0, %arg2 : i32
    %c0_i32 = arith.constant 0 : i32
    %c0_i32_0 = arith.constant 0 : i32
    return %arg0, %c0_i32, %1 : i32, i32, i32
  }
  func.func @transform_1(%arg0: i32, %arg1: i32, %arg2: i32) -> (i32, i32, i32) {
    %c1_i32 = arith.constant 1 : i32
    %0 = arith.muli %arg1, %c1_i32 : i32
    %1 = arith.addi %0, %arg2 : i32
    %c0_i32 = arith.constant 0 : i32
    %c0_i32_0 = arith.constant 0 : i32
    return %arg0, %c0_i32, %1 : i32, i32, i32
  }
  func.func @transform_2(%arg0: i32, %arg1: i32, %arg2: i32) -> (i32, i32) {
    %c0_i32 = arith.constant 0 : i32
    %c0_i32_0 = arith.constant 0 : i32
    %c0_i32_1 = arith.constant 0 : i32
    return %c0_i32, %c0_i32_0 : i32, i32
  }
  func.func @transform_3(%arg0: i32, %arg1: i32, %arg2: i32) -> (i32, i32) {
    %c0_i32 = arith.constant 0 : i32
    %c0_i32_0 = arith.constant 0 : i32
    %c0_i32_1 = arith.constant 0 : i32
    return %c0_i32, %c0_i32_0 : i32, i32
  }
  func.func @transform_4(%arg0: i32, %arg1: i32, %arg2: i32) -> (i32, i32, i32, i32) {
    %c0_i32 = arith.constant 0 : i32
    %c0_i32_0 = arith.constant 0 : i32
    %c0_i32_1 = arith.constant 0 : i32
    return %arg0, %arg1, %c0_i32, %c0_i32_0 : i32, i32, i32, i32
  }
  func.func @transform_5(%arg0: i32, %arg1: i32, %arg2: i32) -> (i32, i32, i32, i32) {
    %c0_i32 = arith.constant 0 : i32
    %c0_i32_0 = arith.constant 0 : i32
    %c0_i32_1 = arith.constant 0 : i32
    return %arg0, %arg1, %c0_i32, %c0_i32_0 : i32, i32, i32, i32
  }
}

</mosaic_0001>

<bundles_post_ra>
// kernel: tpu_custom_call.1
= control target key start
LH: loop header
LB: loop body
LE: loop exit
PB: predicated region body
PF: predicated region fallthrough
CT: control target
= control target key end

     0   :  { %11 = vsyncpa [#allocation5], 0  ;;  %s656_s0 = inlined_call_operand.hbm [shape: f32[2,4,256], index: 0, kind: input, shape index: {}]   ;;  %s657_s1 = inlined_call_operand.hbm [shape: f32[2,4,256], index: 1, kind: input, shape index: {}]   ;;  %s658_s2 = inlined_call_operand.vmem [shape: f32[4,4], index: 2, kind: input, shape index: {}]   ;;  %s659_s3 = inlined_call_operand.vmem [shape: f32[4,4], index: 3, kind: input, shape index: {}]   ;;  %s660_s4 = inlined_call_operand.vmem [shape: f32[1,1,4,1], index: 4, kind: output, shape index: {0}]   ;;  %s661_s5 = inlined_call_operand.vmem [shape: f32[1,1,4,1], index: 5, kind: output, shape index: {1}]  }
   0x1   :  { %12 = vsyncpa [#allocation7], 0  ;;  %s561_s18 = smov [#allocation4]   ;;  %s513_s22 = scalar_lea.hbm %s656_s0, 256 }
   0x2   :  { %s22_s19 = sshll.u32 %s561_s18, 4  ;;  %p514_p0 = scmp.ne.s32.totalorder %s656_s0, %s513_s22  ;;  %s23_s19 = int_to_ptr.vmem [resolvable:$true] %s22_s19 }
   0x3   :  { %p517_p1 = scmp.lt.u32.totalorder %s513_s22, %s656_s0 }
   0x5   :  { %p519_p2 = pnand %p517_p1, %p514_p0 }
   0x7   :  { %522 = shalt.err (!%p519_p2)
}
   0x8   :  { %s523_s27 = scalar_lea.vmem %s23_s19, 256  ;;  %p528_p4 = scmp.lt.s32.totalorder %s23_s19, %s23_s19 }
   0x9   :  { %p524_p3 = scmp.ne.s32.totalorder %s23_s19, %s523_s27  ;;  %p529_p5 = scmp.lt.s32.totalorder %s523_s27, %s523_s27 }
   0xb   :  { %p530_p6 = por %p529_p5, %p528_p4 }
   0xd   :  { %p531_p7 = pnand %p530_p6, %p524_p3 }
   0xf   :  { %534 = shalt.err (!%p531_p7)
}
  0x10   :  { %s562_s28 = smov 128   ;;  %s563_s29 = smov 8  }
  0x11   :  { %28 = dma.hbm_to_vmem [thread:$0]  %s656_s0, 256, %s23_s19, [#allocation5], %s562_s28, %s562_s28, %s563_s29  }
  0x12   :  { %s564_s7 = smov [#allocation6]   ;;  %s535_s11 = scalar_lea.hbm %s657_s1, 256 }
  0x13   :  { %s38_s8 = sshll.u32 %s564_s7, 4  ;;  %p536_p8 = scmp.ne.s32.totalorder %s657_s1, %s535_s11  ;;  %s39_s8 = int_to_ptr.vmem [resolvable:$true] %s38_s8 }
  0x14   :  { %p539_p9 = scmp.lt.u32.totalorder %s535_s11, %s657_s1 }
  0x16   :  { %p541_p10 = pnand %p539_p9, %p536_p8 }
  0x18   :  { %544 = shalt.err (!%p541_p10)
}
  0x19   :  { %s545_s16 = scalar_lea.vmem %s39_s8, 256  ;;  %p550_p12 = scmp.lt.s32.totalorder %s39_s8, %s39_s8 }
  0x1a   :  { %p546_p11 = scmp.ne.s32.totalorder %s39_s8, %s545_s16  ;;  %p551_p13 = scmp.lt.s32.totalorder %s545_s16, %s545_s16 }
  0x1c   :  { %p552_p0 = por %p551_p13, %p550_p12 }
  0x1e   :  { %p553_p1 = pnand %p552_p0, %p546_p11 }
  0x20   :  { %556 = shalt.err (!%p553_p1)
}
  0x21   :  { %44 = dma.hbm_to_vmem [thread:$0]  %s657_s1, 256, %s39_s8, [#allocation7], %s562_s28, %s562_s28, %s563_s29  }
  0x22   :  { %557 = dma.done.wait [#allocation5], 256  }
  0x23   :  { %558 = vsyncadd [#allocation5], 4294967040 }
  0x24   :  { %559 = dma.done.wait [#allocation7], 256  }
  0x25   :  { %560 = vsyncadd [#allocation7], 4294967040  ;;  %v565_v0 = vmov 0.0   ;;  %v71_v1 = vld [vmem:[#allocation6] sm:$0xff]  ;;  %vm78_vm0 = vcmask 1043456   ;;  %v243_v2 = vld [vmem:[#allocation6 + $0x8] sm:$0xff] }
  0x26   :  { %147 = vmatprep.mubr.f32.mxu0 %v565_v0  ;;  %314 = vmatprep.mubr.f32.mxu1 %v565_v0  ;;  %v73_v3 = vcombine.high %v71_v1, %v71_v1  ;;  %v245_v4 = vcombine.high %v243_v2, %v243_v2  ;;  %v70_v5 = vld [vmem:[#allocation4] sm:$0xff]  ;;  %v241_v6 = vld [vmem:[#allocation4 + $0x8] sm:$0xff]  ;;  %v60_v7 = vld [vmem:[%s659_s3] sm:$0xf]  ;;  %vm74_vm1 = vcmask 31744   ;;  %vm432_vm2 = vcmask 3072  }
  0x27   :  { %v155_v8 = vcombine.high %v70_v5, %v70_v5  ;;  %v322_v9 = vcombine.high %v241_v6, %v241_v6  ;;  %v59_v10 = vld [vmem:[%s658_s2] sm:$0xf] }
  0x28   :  { %488 = vmatprep.subr.msk.mxu0 %vm78_vm0, %v73_v3  ;;  %494 = vmatprep.subr.msk.mxu1 %vm78_vm0, %v245_v4 }
  0x29   :  { %489 = vmatpush1.msk.msra.mxu0 %vm78_vm0, %v71_v1  ;;  %495 = vmatpush1.msk.msra.mxu1 %vm78_vm0, %v243_v2 }
  0x2a   :  { %490 = vmatmul.mubr.msk.f32.vlgmr.msra.gmra.mrb[0].mxu0 %vm74_vm1, %v60_v7  ;;  %491 = vmatprep.subr.msk.mxu0 %vm78_vm0, %v155_v8 }
  0x2b   :  { %496 = vmatmul.mubr.msk.f32.vlgmr.msra.gmra.mrb[0].mxu1 %vm74_vm1, %v60_v7  ;;  %492 = vmatpush1.msk.msra.mxu0 %vm78_vm0, %v70_v5 }
  0x2c   :  { %497 = vmatprep.subr.msk.mxu1 %vm78_vm0, %v322_v9  ;;  %227 = vmatprep.mubr.f32.mxu0 %v565_v0 }
  0x2d   :  { %498 = vmatpush1.msk.msra.mxu1 %vm78_vm0, %v241_v6  ;;  %391 = vmatprep.mubr.f32.mxu1 %v565_v0 }
  0x32   :  { %493 = vmatmul.mubr.msk.f32.vlgmr.msra.gmra.mrb[0].mxu0 %vm74_vm1, %v59_v10 }
  0x33   :  { %499 = vmatmul.mubr.msk.f32.vlgmr.msra.gmra.mrb[0].mxu1 %vm74_vm1, %v59_v10 }
 0x105   :  { %v229_v11 = vpop.f32.mrb[0].mxu0 }
 0x106   :  { %v393_v12 = vpop.f32.mrb[0].mxu1  ;;  %v231_v13 = vpop.f32.mrb[1].mxu0  ;;  %v234_v14 = vsel %vm78_vm0, %v229_v11, 0.0 }
 0x107   :  { %v398_v15 = vsel %vm78_vm0, %v393_v12, 0.0  ;;  %v235_v16 = vsel %vm78_vm0, %v231_v13, 0.0  ;;  %v395_v17 = vpop.f32.mrb[1].mxu1 }
 0x108   :  { %v399_v18 = vsel %vm78_vm0, %v395_v17, 0.0  ;;  %v236_v19 = vadd.f32 %v235_v16, %v234_v14 }
 0x109   :  { %v400_v20 = vadd.f32 %v399_v18, %v398_v15 }
 0x10a   :  { %237 = vadd.xlane.f32.xlu0 %v236_v19 }
 0x10e   :  { %401 = vadd.xlane.f32.xlu0 %v400_v20 }
 0x197   :  { %v238_v21 = vpop.xlane.xlu0 %237 }
 0x19b   :  { %v402_v22 = vpop.xlane.xlu0 %401 }
 0x19c   :  { %v403_v23 = vadd.f32 %v402_v22, %v238_v21 }
 0x19e   :  { %v407_v24 = vmul.f32 0.001953125, %v403_v23  ;;  %433 = vst.msk [vmem:[#allocation2] sm:$0xf] %vm432_vm2, %v403_v23 }
 0x1a0   :  { %v408_v25 = vsub.f32 %v229_v11, %v407_v24  ;;  %v409_v26 = vsub.f32 %v231_v13, %v407_v24  ;;  %v418_v27 = vsub.f32 %v393_v12, %v407_v24  ;;  %v419_v28 = vsub.f32 %v395_v17, %v407_v24 }
 0x1a2   :  { %v410_v29 = vmul.f32 %v408_v25, %v408_v25  ;;  %v411_v30 = vmul.f32 %v409_v26, %v409_v26  ;;  %v420_v31 = vmul.f32 %v418_v27, %v418_v27  ;;  %v421_v32 = vmul.f32 %v419_v28, %v419_v28 }
 0x1a4   :  { %v412_v33 = vsel %vm78_vm0, %v410_v29, 0.0  ;;  %v413_v34 = vsel %vm78_vm0, %v411_v30, 0.0  ;;  %v422_v35 = vsel %vm78_vm0, %v420_v31, 0.0  ;;  %v423_v36 = vsel %vm78_vm0, %v421_v32, 0.0 }
 0x1a5   :  { %v473_v37 = vld [vmem:[#allocation2] sm:$0xf]  ;;  %v414_v38 = vadd.f32 %v413_v34, %v412_v33  ;;  %v424_v39 = vadd.f32 %v423_v36, %v422_v35 }
 0x1a6   :  { %475 = vst.msk [vmem:[%s660_s4] sm:$0xf] %vm432_vm2, %v473_v37 }
 0x1a7   :  { %415 = vadd.xlane.f32.xlu1 %v414_v38 }
 0x1ab   :  { %425 = vadd.xlane.f32.xlu1 %v424_v39 }
 0x234   :  { %v416_v40 = vpop.xlane.xlu1 %415 }
 0x238   :  { %v426_v41 = vpop.xlane.xlu1 %425 }
 0x239   :  { %v427_v42 = vadd.f32 %v426_v41, %v416_v40 }
 0x23b   :  { %434 = vst.msk [vmem:[#allocation3] sm:$0xf] %vm432_vm2, %v427_v42 }
 0x242   :  { %v476_v43 = vld [vmem:[#allocation3] sm:$0xf] }
 0x243   :  { %477 = vst.msk [vmem:[%s661_s5] sm:$0xf] %vm432_vm2, %v476_v43 }
 0x244   :  { %486 = vsyncpa [#allocation5], 1 }
 0x245   :  { %487 = vsyncpa [#allocation7], 1 }

</bundles_post_ra>
